<compile_context>
chip_gen: v7x
topology: tpu7x:2x2x1
jax: 0.10.0
libtpu: 0.0.40
codegen_flags: <defaults>
</compile_context>

<pallas_src>
import functools

import jax
import jax.numpy as jnp
from jax.experimental import pallas as pl
from jax.experimental.pallas import tpu as pltpu


# ----------------------------------------------------------------------------
# Pallas kernel: one fused SAGEConv layer (tiled, accumulated over k blocks)
#   out = relu( A @ (x @ Wl^T) + x @ Wr^T + b_l )
# ----------------------------------------------------------------------------
def _sage_layer_kernel(a_ref, xk_ref, xi_ref, wl_ref, wr_ref, bl_ref,
                       o_ref, acc_ref):
    k = pl.program_id(1)

    @pl.when(k == 0)
    def _():
        acc_ref[...] = jnp.zeros_like(acc_ref)

    # Re-associated aggregation: project the (tk, Fin) neighbor block first,
    # then contract with the (tm, tk) adjacency block (bf16 MXU, f32 acc).
    z = jnp.dot(xk_ref[...], wl_ref[...], preferred_element_type=jnp.float32)
    acc_ref[...] += jnp.dot(a_ref[...], z.astype(jnp.bfloat16),
                            preferred_element_type=jnp.float32)

    @pl.when(k == pl.num_programs(1) - 1)
    def _():
        # Self term + bias + ReLU only in the finalize step (f32 epilogue).
        h = (acc_ref[...]
             + jnp.dot(xi_ref[...], wr_ref[...],
                       preferred_element_type=jnp.float32)
             + bl_ref[...])
        o_ref[...] = jnp.maximum(h, 0.0).astype(o_ref.dtype)


def sage_layer(x, adj, wl_t, b_l, wr_t, *, tile_m, tile_k):
    """One SAGEConv + ReLU on padded, tile-divisible operands.

    x:    [Np, Fin_p]  bf16
    adj:  [Np, Np]     bf16 (row-normalized, zero-padded)
    wl_t: [Fin_p, Fout_p] bf16   (lin_l weight, transposed + zero-padded)
    b_l:  [1, Fout_p]  f32
    wr_t: [Fin_p, Fout_p] bf16   (lin_r weight, transposed + zero-padded)
    """
    n_p, f_in_p = x.shape
    f_out_p = wl_t.shape[1]
    assert n_p % tile_m == 0 and n_p % tile_k == 0

    grid = (n_p // tile_m, n_p // tile_k)

    return pl.pallas_call(
        _sage_layer_kernel,
        out_shape=jax.ShapeDtypeStruct((n_p, f_out_p), jnp.bfloat16),
        grid_spec=pltpu.PrefetchScalarGridSpec(
            num_scalar_prefetch=0,
            grid=grid,
            in_specs=[
                pl.BlockSpec((tile_m, tile_k), lambda i, k: (i, k)),    # A tile
                pl.BlockSpec((tile_k, f_in_p), lambda i, k: (k, 0)),    # x (neighbors)
                pl.BlockSpec((tile_m, f_in_p), lambda i, k: (i, 0)),    # x (self rows)
                pl.BlockSpec((f_in_p, f_out_p), lambda i, k: (0, 0)),   # Wl^T
                pl.BlockSpec((f_in_p, f_out_p), lambda i, k: (0, 0)),   # Wr^T
                pl.BlockSpec((1, f_out_p), lambda i, k: (0, 0)),        # bias
            ],
            out_specs=pl.BlockSpec((tile_m, f_out_p), lambda i, k: (i, 0)),
            scratch_shapes=[pltpu.VMEM((tile_m, f_out_p), jnp.float32)],
        ),
        compiler_params=pltpu.CompilerParams(
            dimension_semantics=("parallel", "arbitrary"),
            vmem_limit_bytes=32 * 1024 * 1024,
        ),
    )(adj, x, x, wl_t, wr_t, b_l)


# ----------------------------------------------------------------------------
# Glue: row-normalized adjacency (mean aggregation) + padding helpers
# ----------------------------------------------------------------------------
def build_mean_adjacency(edge_index, num_nodes):
    src = edge_index[0]  # message source j
    dst = edge_index[1]  # message target i
    a = jnp.zeros((num_nodes, num_nodes), dtype=jnp.float32)
    a = a.at[dst, src].add(1.0)            # counts duplicate edges (matches ref)
    deg = jnp.sum(a, axis=1, keepdims=True)
    a = jnp.where(deg > 0, a / jnp.maximum(deg, 1.0), 0.0)
    return a


def _round_up(x, m):
    return ((x + m - 1) // m) * m


def _pad2(a, rows, cols):
    return jnp.pad(a, ((0, rows - a.shape[0]), (0, cols - a.shape[1])))


# ----------------------------------------------------------------------------
# GraphSAGE model
# ----------------------------------------------------------------------------
def init_graphsage_params(key, input_dim, layer_dims):
    dims = [input_dim] + list(layer_dims)
    params = []
    for i in range(1, len(dims)):
        f_in, f_out = dims[i - 1], dims[i]
        key, k1, k2 = jax.random.split(key, 3)
        scale = 1.0 / jnp.sqrt(jnp.float32(f_in))
        w_l = jax.random.uniform(k1, (f_out, f_in), jnp.float32, -scale, scale)
        w_r = jax.random.uniform(k2, (f_out, f_in), jnp.float32, -scale, scale)
        b_l = jnp.zeros((f_out,), jnp.float32)
        params.append((w_l, b_l, w_r))
    return params


@functools.partial(jax.jit, static_argnames=("tile",))
def graphsage_forward(params, node_features, edge_index, *, tile=256):
    assert tile % 128 == 0
    n, f_in = node_features.shape
    n_p = _round_up(n, tile)

    adj = build_mean_adjacency(edge_index, n)
    adj_p = _pad2(adj, n_p, n_p).astype(jnp.bfloat16)     # streamed once, reused per layer

    f_cur_p = _round_up(f_in, 128)
    x = _pad2(node_features.astype(jnp.float32), n_p, f_cur_p).astype(jnp.bfloat16)

    f_out_real = f_in
    for (w_l, b_l, w_r) in params:
        f_out_real = w_l.shape[0]
        f_out_p = _round_up(f_out_real, 128)
        wl_t = _pad2(jnp.transpose(w_l), f_cur_p, f_out_p).astype(jnp.bfloat16)
        wr_t = _pad2(jnp.transpose(w_r), f_cur_p, f_out_p).astype(jnp.bfloat16)
        bl = _pad2(b_l.reshape(1, -1), 1, f_out_p).astype(jnp.float32)
        x = sage_layer(x, adj_p, wl_t, bl, wr_t, tile_m=tile, tile_k=tile)
        f_cur_p = f_out_p
        # TODO(synk): dropout is identity in eval mode (training=False), so omitted.

    return x[:n, :f_out_real].astype(jnp.float32)


# ----------------------------------------------------------------------------
# Pure-JAX f32 reference for sanity checking
# ----------------------------------------------------------------------------
def graphsage_reference(params, node_features, edge_index):
    n = node_features.shape[0]
    adj = build_mean_adjacency(edge_index, n)
    x = node_features.astype(jnp.float32)
    for (w_l, b_l, w_r) in params:
        agg = adj @ x
        h = agg @ w_l.T + b_l[None, :] + x @ w_r.T
        x = jnp.maximum(h, 0.0)
    return x


if __name__ == "__main__":
    key = jax.random.PRNGKey(0)
    k_feat, k_edge, k_param = jax.random.split(key, 3)

    # Small synthetic graph: N nodes, F input features, E edges.
    N, F_IN, E = 200, 32, 800
    LAYER_DIMS = [32, 16]
    TILE = 128  # padded N = 256 -> grid (2, 2): exercises pipeline + reduction

    node_features = jax.random.normal(k_feat, (N, F_IN), jnp.float32)
    edge_index = jax.random.randint(k_edge, (2, E), 0, N, dtype=jnp.int32)

    params = init_graphsage_params(k_param, F_IN, LAYER_DIMS)

    out = graphsage_forward(params, node_features, edge_index, tile=TILE)
    out = jax.block_until_ready(out)

    ref = graphsage_reference(params, node_features, edge_index)
    assert out.shape == (N, LAYER_DIMS[-1])
    # bf16 MXU operands -> loosened tolerance vs the f32 reference.
    assert jnp.allclose(out, ref, atol=1e-1, rtol=1e-1), "mismatch vs reference"

    print("KERNEL_OK")
</pallas_src>

<mosaic_0001>
module attributes {stable_mosaic.version = 11 : i64} {
  func.func private @main(%arg0: i32) attributes {dimension_semantics = [#tpu.dimension_semantics<core_parallel>], iteration_bounds = array<i64: 2>, tpu.core_type = #tpu.core_type<sc_scalar_subcore>, window_params = []} {
    return
  }
}

module attributes {stable_mosaic.version = 11 : i64} {
  func.func private @main(%arg0: i32) attributes {dimension_semantics = [#tpu.dimension_semantics<core_parallel>], iteration_bounds = array<i64: 2>, tpu.core_type = #tpu.core_type<sc_scalar_subcore>, window_params = []} {
    return
  }
}

module attributes {stable_mosaic.version = 11 : i64} {
  func.func @_sage_layer_kernel(%arg0: i32, %arg1: i32, %arg2: memref<128x128xbf16, #tpu.memory_space<vmem>>, %arg3: memref<128x128xbf16, #tpu.memory_space<vmem>>, %arg4: memref<128x128xbf16, #tpu.memory_space<vmem>>, %arg5: memref<128x128xbf16, #tpu.memory_space<vmem>>, %arg6: memref<128x128xbf16, #tpu.memory_space<vmem>>, %arg7: memref<1x128xf32, #tpu.memory_space<vmem>>, %arg8: memref<128x128xbf16, #tpu.memory_space<vmem>>, %arg9: memref<128x128xf32, #tpu.memory_space<vmem>>) attributes {dimension_semantics = [#tpu.dimension_semantics<parallel>, #tpu.dimension_semantics<arbitrary>], iteration_bounds = array<i64: 2, 2>, scalar_prefetch = 0 : i64, scratch_operands = 1 : i64, tpu.core_type = #tpu.core_type<tc>, window_params = [{transform_indices = @transform_0, window_bounds = array<i64: 128, 128>}, {transform_indices = @transform_1, window_bounds = array<i64: 128, 128>}, {transform_indices = @transform_2, window_bounds = array<i64: 128, 128>}, {pipeline_mode = #tpu.pipeline_mode<synchronous>, transform_indices = @transform_3, window_bounds = array<i64: 128, 128>}, {pipeline_mode = #tpu.pipeline_mode<synchronous>, transform_indices = @transform_4, window_bounds = array<i64: 128, 128>}, {pipeline_mode = #tpu.pipeline_mode<synchronous>, transform_indices = @transform_5, window_bounds = array<i64: 1, 128>}, {transform_indices = @transform_6, window_bounds = array<i64: 128, 128>}]} {
    %c0_i32 = arith.constant 0 : i32
    %0 = arith.cmpi eq, %arg1, %c0_i32 : i32
    %1 = arith.extui %0 : i1 to i32
    %c0_i32_0 = arith.constant 0 : i32
    %2 = arith.cmpi ne, %1, %c0_i32_0 : i32
    scf.if %2 {
      %cst_12 = arith.constant 0.000000e+00 : f32
      %15 = vector.broadcast %cst_12 : f32 to vector<128x128xf32>
      %c0_13 = arith.constant 0 : index
      %c0_14 = arith.constant 0 : index
      %16 = vector.load %arg9[%c0_13, %c0_14] : memref<128x128xf32, #tpu.memory_space<vmem>>, vector<128x128xf32>
      tpu.vector_store %arg9[%c0_13, %c0_14], %15 {strides = array<i32>} : memref<128x128xf32, #tpu.memory_space<vmem>>, vector<128x128xf32>,
    } else {
    }
    %c0 = arith.constant 0 : index
    %c0_1 = arith.constant 0 : index
    %3 = vector.load %arg3[%c0, %c0_1] : memref<128x128xbf16, #tpu.memory_space<vmem>>, vector<128x128xbf16>
    %c0_2 = arith.constant 0 : index
    %c0_3 = arith.constant 0 : index
    %4 = vector.load %arg5[%c0_2, %c0_3] : memref<128x128xbf16, #tpu.memory_space<vmem>>, vector<128x128xbf16>
    %cst = arith.constant dense<0.000000e+00> : vector<128x128xf32>
    %5 = tpu.matmul %3, %4, %cst {dimension_numbers = #tpu.dot_dimension_numbers<[1], [0], [0], [1], [0, 0, 1, 1], [], []>} : vector<128x128xbf16>, vector<128x128xbf16>, vector<128x128xf32> -> vector<128x128xf32>
    %c0_4 = arith.constant 0 : index
    %c0_5 = arith.constant 0 : index
    %6 = vector.load %arg9[%c0_4, %c0_5] : memref<128x128xf32, #tpu.memory_space<vmem>>, vector<128x128xf32>
    %c0_6 = arith.constant 0 : index
    %c0_7 = arith.constant 0 : index
    %7 = vector.load %arg2[%c0_6, %c0_7] : memref<128x128xbf16, #tpu.memory_space<vmem>>, vector<128x128xbf16>
    %8 = arith.truncf %5 : vector<128x128xf32> to vector<128x128xbf16>
    %cst_8 = arith.constant dense<0.000000e+00> : vector<128x128xf32>
    %9 = tpu.matmul %7, %8, %cst_8 {dimension_numbers = #tpu.dot_dimension_numbers<[1], [0], [0], [1], [0, 0, 1, 1], [], []>} : vector<128x128xbf16>, vector<128x128xbf16>, vector<128x128xf32> -> vector<128x128xf32>
    %10 = arith.addf %6, %9 : vector<128x128xf32>
    %c0_9 = arith.constant 0 : index
    %c0_10 = arith.constant 0 : index
    %11 = vector.load %arg9[%c0_9, %c0_10] : memref<128x128xf32, #tpu.memory_space<vmem>>, vector<128x128xf32>
    tpu.vector_store %arg9[%c0_9, %c0_10], %10 {strides = array<i32>} : memref<128x128xf32, #tpu.memory_space<vmem>>, vector<128x128xf32>,
    %c1_i32 = arith.constant 1 : i32
    %12 = arith.cmpi eq, %arg1, %c1_i32 : i32
    %13 = arith.extui %12 : i1 to i32
    %c0_i32_11 = arith.constant 0 : i32
    %14 = arith.cmpi ne, %13, %c0_i32_11 : i32
    scf.if %14 {
      %c0_12 = arith.constant 0 : index
      %c0_13 = arith.constant 0 : index
      %15 = vector.load %arg9[%c0_12, %c0_13] : memref<128x128xf32, #tpu.memory_space<vmem>>, vector<128x128xf32>
      %c0_14 = arith.constant 0 : index
      %c0_15 = arith.constant 0 : index
      %16 = vector.load %arg4[%c0_14, %c0_15] : memref<128x128xbf16, #tpu.memory_space<vmem>>, vector<128x128xbf16>
      %c0_16 = arith.constant 0 : index
      %c0_17 = arith.constant 0 : index
      %17 = vector.load %arg6[%c0_16, %c0_17] : memref<128x128xbf16, #tpu.memory_space<vmem>>, vector<128x128xbf16>
      %cst_18 = arith.constant dense<0.000000e+00> : vector<128x128xf32>
      %18 = tpu.matmul %16, %17, %cst_18 {dimension_numbers = #tpu.dot_dimension_numbers<[1], [0], [0], [1], [0, 0, 1, 1], [], []>} : vector<128x128xbf16>, vector<128x128xbf16>, vector<128x128xf32> -> vector<128x128xf32>
      %19 = arith.addf %15, %18 : vector<128x128xf32>
      %c0_19 = arith.constant 0 : index
      %c0_20 = arith.constant 0 : index
      %20 = vector.load %arg7[%c0_19, %c0_20] : memref<1x128xf32, #tpu.memory_space<vmem>>, vector<1x128xf32>
      %21 = vector.broadcast %20 : vector<1x128xf32> to vector<128x128xf32>
      %22 = arith.addf %19, %21 : vector<128x128xf32>
      %cst_21 = arith.constant 0.000000e+00 : f32
      %23 = vector.broadcast %cst_21 : f32 to vector<128x128xf32>
      %24 = arith.maximumf %22, %23 : vector<128x128xf32>
      %25 = arith.truncf %24 : vector<128x128xf32> to vector<128x128xbf16>
      %c0_22 = arith.constant 0 : index
      %c0_23 = arith.constant 0 : index
      %26 = vector.load %arg8[%c0_22, %c0_23] : memref<128x128xbf16, #tpu.memory_space<vmem>>, vector<128x128xbf16>
      tpu.vector_store %arg8[%c0_22, %c0_23], %25 {strides = array<i32>} : memref<128x128xbf16, #tpu.memory_space<vmem>>, vector<128x128xbf16>,
    } else {
    }
    return
  }
  func.func @transform_0(%arg0: i32, %arg1: i32) -> (i32, i32) {
    %c0_i32 = arith.constant 0 : i32
    return %arg0, %arg1 : i32, i32
  }
  func.func @transform_1(%arg0: i32, %arg1: i32) -> (i32, i32) {
    %c0_i32 = arith.constant 0 : i32
    %c0_i32_0 = arith.constant 0 : i32
    return %arg1, %c0_i32 : i32, i32
  }
  func.func @transform_2(%arg0: i32, %arg1: i32) -> (i32, i32) {
    %c0_i32 = arith.constant 0 : i32
    %c0_i32_0 = arith.constant 0 : i32
    return %arg0, %c0_i32 : i32, i32
  }
  func.func @transform_3(%arg0: i32, %arg1: i32) -> (i32, i32) {
    %c0_i32 = arith.constant 0 : i32
    %c0_i32_0 = arith.constant 0 : i32
    %c0_i32_1 = arith.constant 0 : i32
    return %c0_i32, %c0_i32_0 : i32, i32
  }
  func.func @transform_4(%arg0: i32, %arg1: i32) -> (i32, i32) {
    %c0_i32 = arith.constant 0 : i32
    %c0_i32_0 = arith.constant 0 : i32
    %c0_i32_1 = arith.constant 0 : i32
    return %c0_i32, %c0_i32_0 : i32, i32
  }
  func.func @transform_5(%arg0: i32, %arg1: i32) -> (i32, i32) {
    %c0_i32 = arith.constant 0 : i32
    %c0_i32_0 = arith.constant 0 : i32
    %c0_i32_1 = arith.constant 0 : i32
    return %c0_i32, %c0_i32_0 : i32, i32
  }
  func.func @transform_6(%arg0: i32, %arg1: i32) -> (i32, i32) {
    %c0_i32 = arith.constant 0 : i32
    %c0_i32_0 = arith.constant 0 : i32
    return %arg0, %c0_i32 : i32, i32
  }
}

</mosaic_0001>

<bundles_post_ra>
// kernel: graphsage_forward.2
= control target key start
LH: loop header
LB: loop body
LE: loop exit
PB: predicated region body
PF: predicated region fallthrough
CT: control target
= control target key end

     0   :  { %s1849_s21 = smov 0   ;;  %s1851_s22 = smov 0   ;;  %s2073_s0 = inlined_call_operand.vmem [shape: bf16[256,256], index: 0, kind: input, shape index: {}]   ;;  %s2074_s1 = inlined_call_operand.vmem [shape: bf16[256,128], index: 1, kind: input, shape index: {}, may-alias: {1,2}]   ;;  %s2075_s2 = inlined_call_operand.vmem [shape: bf16[256,128], index: 2, kind: input, shape index: {}, may-alias: {1,2}]   ;;  %s2076_s3 = inlined_call_operand.vmem [shape: bf16[128,128], index: 3, kind: input, shape index: {}]   ;;  %s2077_s4 = inlined_call_operand.vmem [shape: bf16[128,128], index: 4, kind: input, shape index: {}]   ;;  %s2078_s5 = inlined_call_operand.vmem [shape: f32[1,128], index: 5, kind: input, shape index: {}]   ;;  %s2079_s6 = inlined_call_operand.vmem [shape: bf16[256,128], index: 6, kind: output, shape index: {}]  }
   0x1   :  { %s1853_s23 = smov 0   ;;  %s1855_s24 = smov 0  }
   0x2   :  { %s1857_s25 = smov 0   ;;  %s1859_s26 = smov 0  }
   0x3   :  { %s1861_s27 = smov 0  }
   0x4 LB: > { %s25_s28 = sadd.s32 1, %s1803_s25  ;;  %s28_s29 = sadd.s32 1, %s1807_s26  ;;  %s1811_s27 = sphi %s1861_s27, %s16_s27   ;;  %s1807_s26 = sphi %s1859_s26, %s2085_s26   ;;  %s1803_s25 = sphi %s1857_s25, %s2084_s25   ;;  %s1799_s24 = sphi %s1855_s24, %s2083_s24   ;;  %s1795_s23 = sphi %s1853_s23, %s2082_s23   ;;  %s1791_s22 = sphi %s1851_s22, %s2081_s22   ;;  %s1787_s21 = sphi %s1849_s21, %s2080_s21  }
   0x5   : > { %p26_p0 = scmp.ge.s32.totalorder %s25_s28, 2  ;;  %p44_p1 = scmp.ne.s32.totalorder %s1791_s22, %s1787_s21 }
   0x6   : > { %p45_p2 = scmp.eq.s32.totalorder %s1811_s27, 0  ;;  %s37_s9 = sadd.s32 1, %s1791_s22 }
   0x7   : > { %s2087_s28 = smov (%p26_p0, %s25_s28), 0  ;;  %s2089_s29 = smov (!%p26_p0, %s28_s29), %s1807_s26 }
   0x8   : > { %p46_p3 = por %p45_p2, %p44_p1  ;;  %p30_p4 = scmp.ge.s32.totalorder %s2089_s29, 2 }
   0x9   : > { %s33_s30 = ssub.s32 %s1803_s25, %s2087_s28  ;;  %p1362_p6 = scmp.ge.s32.totalorder %s1811_s27, 4 }
   0xa   : > { %s2091_s29 = smov (%p30_p4, %s2089_s29), 0 }
   0xb   : > { %s32_s7 = ssub.s32 %s1807_s26, %s2091_s29  ;;  %220 = sbr.rel (%p1362_p6) target bundleno = 34 (0x22), region = 28 }
   0xc   : > { %s34_s8 = sor.u32 %s33_s30, %s32_s7 }
   0xd   : > { %p35_p5 = scmp.eq.s32.totalorder %s34_s8, 0 }
   0xf   : > { %s1900_s10 = scalar_select %p35_p5, %s1791_s22, %s37_s9  }
  0x12   : > { %223 = sbr.rel (!%p46_p3) target bundleno = 34 (0x22), region = 32  ;;  %s225_s11 = sand.u32 (%p46_p3), 1, %s1791_s22  }
  0x13   : > { %s1436_s12 = sshll.u32 (%p46_p3), %s1807_s26, 5  ;;  %s1363_s13 = sshll.u32 (%p46_p3), %s225_s11, 6 }
  0x14   : > { %s230_s14 = sadd.s32 (%p46_p3), %s1803_s25, %s1436_s12  ;;  %s227_s19 = scalar_lea.vmem (%p46_p3), [#allocation3], %s1363_s13 }
  0x15   : > { %s1366_s15 = sshll.u32 (%p46_p3), %s230_s14, 2 }
  0x16   : > { %s1909_s18 = scalar_lea.vmem (%p46_p3), %s2073_s0, %s1366_s15 }
  0x17   : > { %v248_v0 = vld [vmem:[%s1909_s18] sm:$0xf] (%p46_p3)  ;;  %v250_v1 = vld [vmem:[%s1909_s18 + $0x8] sm:$0xf] (%p46_p3)  ;;  %v252_v2 = vld [vmem:[%s1909_s18 + $0x10] sm:$0xf] (%p46_p3) }
  0x18   : > { %249 = vst [vmem:[%s227_s19] sm:$0xf] (%p46_p3), %v248_v0  ;;  %251 = vst [vmem:[%s227_s19 + $0x4] sm:$0xf] (%p46_p3), %v250_v1  ;;  %v254_v3 = vld [vmem:[%s1909_s18 + $0x18] sm:$0xf] (%p46_p3) }
  0x19   : > { %253 = vst [vmem:[%s227_s19 + $0x8] sm:$0xf] %v252_v2  ;;  %v256_v4 = vld [vmem:[%s1909_s18 + $0x20] sm:$0xf]  ;;  %v258_v5 = vld [vmem:[%s1909_s18 + $0x28] sm:$0xf] }
  0x1a   : > { %255 = vst [vmem:[%s227_s19 + $0xc] sm:$0xf] %v254_v3  ;;  %257 = vst [vmem:[%s227_s19 + $0x10] sm:$0xf] %v256_v4  ;;  %v260_v6 = vld [vmem:[%s1909_s18 + $0x30] sm:$0xf] }
  0x1b   : > { %259 = vst [vmem:[%s227_s19 + $0x14] sm:$0xf] %v258_v5  ;;  %v262_v7 = vld [vmem:[%s1909_s18 + $0x38] sm:$0xf]  ;;  %v264_v8 = vld [vmem:[%s1909_s18 + $0x40] sm:$0xf] }
  0x1c   : > { %261 = vst [vmem:[%s227_s19 + $0x18] sm:$0xf] %v260_v6  ;;  %263 = vst [vmem:[%s227_s19 + $0x1c] sm:$0xf] %v262_v7  ;;  %v266_v9 = vld [vmem:[%s1909_s18 + $0x48] sm:$0xf] }
  0x1d   : > { %265 = vst [vmem:[%s227_s19 + $0x20] sm:$0xf] %v264_v8  ;;  %v268_v10 = vld [vmem:[%s1909_s18 + $0x50] sm:$0xf]  ;;  %v270_v11 = vld [vmem:[%s1909_s18 + $0x58] sm:$0xf] }
  0x1e   : > { %267 = vst [vmem:[%s227_s19 + $0x24] sm:$0xf] %v266_v9  ;;  %269 = vst [vmem:[%s227_s19 + $0x28] sm:$0xf] %v268_v10  ;;  %v272_v12 = vld [vmem:[%s1909_s18 + $0x60] sm:$0xf] }
  0x1f   : > { %271 = vst [vmem:[%s227_s19 + $0x2c] sm:$0xf] %v270_v11  ;;  %v274_v13 = vld [vmem:[%s1909_s18 + $0x68] sm:$0xf]  ;;  %v276_v14 = vld [vmem:[%s1909_s18 + $0x70] sm:$0xf] }
  0x20   : > { %273 = vst [vmem:[%s227_s19 + $0x30] sm:$0xf] %v272_v12  ;;  %275 = vst [vmem:[%s227_s19 + $0x34] sm:$0xf] %v274_v13  ;;  %v278_v15 = vld [vmem:[%s1909_s18 + $0x78] sm:$0xf] }
  0x21   : > { %277 = vst [vmem:[%s227_s19 + $0x38] sm:$0xf] %v276_v14  ;;  %279 = vst [vmem:[%s227_s19 + $0x3c] sm:$0xf] %v278_v15 }
  0x22 PF: > { %p1367_p7 = scmp.ge.s32.totalorder %s1811_s27, 1  ;;  %p351_p8 = scmp.lt.s32.totalorder %s1811_s27, 5 }
  0x24   : > { %p352_p9 = pnand %p1367_p7, %p351_p8 }
  0x25   : > { %s358_s20 = sand.u32 (!%p352_p9), 1, %s1787_s21   ;;  %s1369_s30 = sshll.u32 (!%p352_p9), %s1795_s23, 4 }
  0x26   : > { %355 = sbr.rel (%p352_p9) target bundleno = 783 (0x30f), region = 81  ;;  %s1368_s7 = sshll.u32 (!%p352_p9), %s358_s20, 6 }
  0x27   : > { %p399_p10 = scmp.lt.s32.totalorder (!%p352_p9), %s1369_s30, 31  ;;  %s1371_s8 = sshll.u32 (!%p352_p9), %s1799_s24, 4 }
  0x28   : > { %p405_p11 = scmp.lt.s32.totalorder (!%p352_p9), %s1371_s8, 31  ;;  %s1947_s24 = scalar_lea.vmem (!%p352_p9), [#allocation3], %s1368_s7 }
  0x29   : > { %p1375_p12 = scmp.ne.s32.totalorder (!%p352_p9), %s1795_s23, 0 }
  0x2d   : > { %s2093_s30 = smov (!%p399_p10, %s1369_s30), 31  ;;  %s2095_s8 = smov (!%p405_p11, %s1371_s8), 31 }
  0x2e   : > { %s1370_s9 = sshll.u32 %s2093_s30, 2  ;;  %s1372_s14 = sshll.u32 %s2095_s8, 2  ;;  %v1813_v16 = vmov (!%p1375_p12), 0.0  }
  0x2f   : > { %s1935_s13 = scalar_lea.vmem %s2074_s1, %s1370_s9  ;;  %s1940_s17 = scalar_lea.vmem %s2075_s2, %s1372_s14  ;;  %421 = vst [vmem:[#allocation2] sm:$0xff] (!%p1375_p12), %v1813_v16  ;;  %422 = vst [vmem:[#allocation2 + $0x8] sm:$0xff] (!%p1375_p12), %v1813_v16 }
  0x30   : > { %s1945_s19 = scalar_lea.vmem %s2079_s6, %s1372_s14  ;;  %420 = sbr.rel (%p1375_p12) target bundleno = 55 (0x37), region = 89  ;;  %423 = vst [vmem:[#allocation2 + $0x10] sm:$0xff] (!%p1375_p12), %v1813_v16  ;;  %424 = vst [vmem:[#allocation2 + $0x18] sm:$0xff] (!%p1375_p12), %v1813_v16 }
  0x31   : > { %425 = vst [vmem:[#allocation2 + $0x20] sm:$0xff] (!%p1375_p12), %v1813_v16  ;;  %426 = vst [vmem:[#allocation2 + $0x28] sm:$0xff] (!%p1375_p12), %v1813_v16 }
  0x32   : > { %427 = vst [vmem:[#allocation2 + $0x30] sm:$0xff] (!%p1375_p12), %v1813_v16  ;;  %428 = vst [vmem:[#allocation2 + $0x38] sm:$0xff] (!%p1375_p12), %v1813_v16 }
  0x33   : > { %429 = vst [vmem:[#allocation2 + $0x40] sm:$0xff] (!%p1375_p12), %v1813_v16  ;;  %430 = vst [vmem:[#allocation2 + $0x48] sm:$0xff] (!%p1375_p12), %v1813_v16 }
  0x34   : > { %431 = vst [vmem:[#allocation2 + $0x50] sm:$0xff] (!%p1375_p12), %v1813_v16  ;;  %432 = vst [vmem:[#allocation2 + $0x58] sm:$0xff] (!%p1375_p12), %v1813_v16 }
  0x35   : > { %433 = vst [vmem:[#allocation2 + $0x60] sm:$0xff] (!%p1375_p12), %v1813_v16  ;;  %434 = vst [vmem:[#allocation2 + $0x68] sm:$0xff] (!%p1375_p12), %v1813_v16 }
  0x36   : > { %435 = vst [vmem:[#allocation2 + $0x70] sm:$0xff] (!%p1375_p12), %v1813_v16  ;;  %436 = vst [vmem:[#allocation2 + $0x78] sm:$0xff] (!%p1375_p12), %v1813_v16 }
  0x37 PF: > { %v1717_v17 = vld [vmem:[%s2076_s3] sm:$0xff]   ;;  %v1718_v18 = vld [vmem:[%s2076_s3 + $0x8] sm:$0xff]   ;;  %v1719_v19 = vld [vmem:[%s2076_s3 + $0x10] sm:$0xff]   ;;  %p1400_p13 = scmp.ne.s32.totalorder %s1795_s23, 1 }
  0x38   : > { %1548 = vmatprep.subr.bf16.mxu0 %v1717_v17  ;;  %v1720_v20 = vld [vmem:[%s2076_s3 + $0x18] sm:$0xff]   ;;  %v1725_v21 = vld [vmem:[%s1935_s13] sm:$0xff]   ;;  %v1722_v23 = vld [vmem:[%s2076_s3 + $0x28] sm:$0xff]  }
  0x39   : > { %1549 = vmatpush3.bf16.msra.mxu0 %v1717_v17  ;;  %1564 = vmatprep.mubr.bf16.mxu0 %v1725_v21  ;;  %v1721_v22 = vld [vmem:[%s2076_s3 + $0x20] sm:$0xff]   ;;  %v1723_v24 = vld [vmem:[%s2076_s3 + $0x30] sm:$0xff]   ;;  %v1724_v25 = vld [vmem:[%s2076_s3 + $0x38] sm:$0xff]  }
  0x3a   : > { %1550 = vmatprep.subr.bf16.mxu0 %v1718_v18  ;;  %v1726_v26 = vld [vmem:[%s1935_s13 + $0x8] sm:$0xff]   ;;  %v1727_v27 = vld [vmem:[%s1935_s13 + $0x10] sm:$0xff]   ;;  %v1728_v28 = vld [vmem:[%s1935_s13 + $0x18] sm:$0xff]  }
  0x3b   : > { %v1729_v29 = vld [vmem:[%s1935_s13 + $0x20] sm:$0xff]   ;;  %v1730_v30 = vld [vmem:[%s1935_s13 + $0x28] sm:$0xff]   ;;  %v1731_v31 = vld [vmem:[%s1935_s13 + $0x30] sm:$0xff]  }
  0x3c   : > { %v1732_v32 = vld [vmem:[%s1935_s13 + $0x38] sm:$0xff]   ;;  %v1733_v33 = vld [vmem:[%s1947_s24] sm:$0xff]   ;;  %v1734_v58 = vld [vmem:[%s1947_s24 + $0x8] sm:$0xff]  }
  0x3d   : > { %1551 = vmatpush3.bf16.msra.mxu0 %v1718_v18  ;;  %1596 = vmatprep.mubr.bf16.mxu1 %v1733_v33  ;;  %v1735_v59 = vld [vmem:[%s1947_s24 + $0x10] sm:$0xff]   ;;  %v1736_v60 = vld [vmem:[%s1947_s24 + $0x18] sm:$0xff]   ;;  %v1737_v61 = vld [vmem:[%s1947_s24 + $0x20] sm:$0xff]  }
  0x3e   : > { %1552 = vmatprep.subr.bf16.mxu0 %v1719_v19  ;;  %v1738_v62 = vld [vmem:[%s1947_s24 + $0x28] sm:$0xff]   ;;  %v1739_v63 = vld [vmem:[%s1947_s24 + $0x30] sm:$0xff]   ;;  %v1740_v0 = vld [vmem:[%s1947_s24 + $0x38] sm:$0xff]  }
  0x3f   : > { %v664_v1 = vld [vmem:[#allocation2 + $0x10] sm:$0xff]  ;;  %v662_v2 = vld [vmem:[#allocation2] sm:$0xff]  ;;  %v665_v4 = vld [vmem:[#allocation2 + $0x18] sm:$0xff] }
  0x40   : > { %v663_v7 = vld [vmem:[#allocation2 + $0x8] sm:$0xff]  ;;  %v668_v13 = vld [vmem:[#allocation2 + $0x30] sm:$0xff]  ;;  %v666_v14 = vld [vmem:[#allocation2 + $0x20] sm:$0xff] }
  0x41   : > { %1553 = vmatpush3.bf16.msra.mxu0 %v1719_v19  ;;  %v669_v16 = vld [vmem:[#allocation2 + $0x38] sm:$0xff]  ;;  %v667_v19 = vld [vmem:[#allocation2 + $0x28] sm:$0xff] }
  0x42   : > { %1554 = vmatprep.subr.bf16.mxu0 %v1720_v20 }
  0x45   : > { %1555 = vmatpush3.bf16.msra.mxu0 %v1720_v20 }
  0x46   : > { %1556 = vmatprep.subr.bf16.mxu0 %v1721_v22 }
  0x49   : > { %1557 = vmatpush3.bf16.msra.mxu0 %v1721_v22 }
  0x4a   : > { %1558 = vmatprep.subr.bf16.mxu0 %v1722_v23 }
  0x4d   : > { %1559 = vmatpush3.bf16.msra.mxu0 %v1722_v23 }
  0x4e   : > { %1560 = vmatprep.subr.bf16.mxu0 %v1723_v24 }
  0x51   : > { %1561 = vmatpush3.bf16.msra.mxu0 %v1723_v24 }
  0x52   : > { %1562 = vmatprep.subr.bf16.mxu0 %v1724_v25 }
  0x55   : > { %1563 = vmatpush3.bf16.msra.mxu0 %v1724_v25  ;;  %v672_v25 = vld [vmem:[#allocation2 + $0x50] sm:$0xff] }
  0x58   : > { %1565 = vmatmul.mubr.bf16.vlgmr.msra.gmra.mrb[0].mxu0 %v1726_v26  ;;  %v670_v26 = vld [vmem:[#allocation2 + $0x40] sm:$0xff] }
  0x59   : > { %1568 = vmatprep.mubr.bf16.mxu0 %v1727_v27 }
  0x60   : > { %1569 = vmatmul.mubr.bf16.gmra.mrb[4].mxu0 %v1728_v28  ;;  %v673_v28 = vld [vmem:[#allocation2 + $0x58] sm:$0xff] }
  0x61   : > { %1572 = vmatprep.mubr.bf16.mxu0 %v1729_v29 }
  0x68   : > { %1573 = vmatmul.mubr.bf16.gmra.mrb[8].mxu0 %v1730_v30 }
  0x69   : > { %1576 = vmatprep.mubr.bf16.mxu0 %v1731_v31  ;;  %v671_v31 = vld [vmem:[#allocation2 + $0x48] sm:$0xff] }
  0x70   : > { %1577 = vmatmul.mubr.bf16.gmra.mrb[12].mxu0 %v1732_v32 }
 0x12b   : > { %v1566_v34 = vpop.f32.mrb[0].mxu0 }
 0x12c   : > { %v599_v35 = vpop.f32.mrb[1].mxu0 }
 0x12d   : > { %v1567_v36 = vpop.f32.mrb[2].mxu0 }
 0x12e   : > { %v695_v37 = vpack.c.bf16 %v1567_v36, %v1566_v34  ;;  %v602_v38 = vpop.f32.mrb[3].mxu0 }
 0x12f   : > { %v694_v39 = vpack.c.bf16 %v602_v38, %v599_v35  ;;  %v674_v38 = vld [vmem:[#allocation2 + $0x60] sm:$0xff] }
 0x131   : > { %1580 = vmatprep.subr.bf16.mxu1 %v694_v39 }
 0x132   : > { %1581 = vmatpush3.bf16.msra.mxu1 %v694_v39 }
 0x133   : > { %v1570_v40 = vpop.f32.mrb[4].mxu0  ;;  %1582 = vmatprep.subr.bf16.mxu1 %v695_v37 }
 0x134   : > { %v615_v41 = vpop.f32.mrb[5].mxu0 }
 0x135   : > { %v1571_v42 = vpop.f32.mrb[6].mxu0 }
 0x136   : > { %v697_v43 = vpack.c.bf16 %v1571_v42, %v1570_v40  ;;  %v618_v44 = vpop.f32.mrb[7].mxu0  ;;  %1583 = vmatpush3.bf16.msra.mxu1 %v695_v37  ;;  %v676_v37 = vld [vmem:[#allocation2 + $0x70] sm:$0xff]  ;;  %v677_v40 = vld [vmem:[#allocation2 + $0x78] sm:$0xff] }
 0x137   : > { %v696_v45 = vpack.c.bf16 %v618_v44, %v615_v41 }
 0x139   : > { %1584 = vmatprep.subr.bf16.mxu1 %v696_v45 }
 0x13a   : > { %1585 = vmatpush3.bf16.msra.mxu1 %v696_v45 }
 0x13b   : > { %v1574_v46 = vpop.f32.mrb[8].mxu0  ;;  %1586 = vmatprep.subr.bf16.mxu1 %v697_v43 }
 0x13c   : > { %v631_v47 = vpop.f32.mrb[9].mxu0 }
 0x13d   : > { %v1575_v48 = vpop.f32.mrb[10].mxu0 }
 0x13e   : > { %v699_v49 = vpack.c.bf16 %v1575_v48, %v1574_v46  ;;  %v634_v50 = vpop.f32.mrb[11].mxu0  ;;  %1587 = vmatpush3.bf16.msra.mxu1 %v697_v43  ;;  %v675_v43 = vld [vmem:[#allocation2 + $0x68] sm:$0xff] }
 0x13f   : > { %v698_v51 = vpack.c.bf16 %v634_v50, %v631_v47  ;;  %v1742_v50 = vld [vmem:[%s2077_s4 + $0x8] sm:$0xff] (!%p1400_p13)  }
 0x141   : > { %1588 = vmatprep.subr.bf16.mxu1 %v698_v51 }
 0x142   : > { %1589 = vmatpush3.bf16.msra.mxu1 %v698_v51  ;;  %v1743_v51 = vld [vmem:[%s2077_s4 + $0x10] sm:$0xff] (!%p1400_p13)  }
 0x143   : > { %v1578_v52 = vpop.f32.mrb[12].mxu0  ;;  %1590 = vmatprep.subr.bf16.mxu1 %v699_v49 }
 0x144   : > { %v647_v53 = vpop.f32.mrb[13].mxu0 }
 0x145   : > { %v1579_v54 = vpop.f32.mrb[14].mxu0 }
 0x146   : > { %v701_v55 = vpack.c.bf16 %v1579_v54, %v1578_v52  ;;  %v650_v56 = vpop.f32.mrb[15].mxu0  ;;  %1591 = vmatpush3.bf16.msra.mxu1 %v699_v49  ;;  %v1741_v49 = vld [vmem:[%s2077_s4] sm:$0xff] (!%p1400_p13)   ;;  %v1744_v52 = vld [vmem:[%s2077_s4 + $0x18] sm:$0xff] (!%p1400_p13)  }
 0x147   : > { %v700_v57 = vpack.c.bf16 %v650_v56, %v647_v53  ;;  %1612 = vmatprep.subr.bf16.mxu0 (!%p1400_p13), %v1741_v49  ;;  %v1749_v53 = vld [vmem:[%s1940_s17] sm:$0xff] (!%p1400_p13)   ;;  %v1746_v56 = vld [vmem:[%s2077_s4 + $0x28] sm:$0xff] (!%p1400_p13)  }
 0x148   : > { %1613 = vmatpush3.bf16.msra.mxu0 (!%p1400_p13), %v1741_v49  ;;  %v1750_v54 = vld [vmem:[%s1940_s17 + $0x20] sm:$0xff] (!%p1400_p13)   ;;  %1628 = vmatprep.mubr.bf16.mxu0 (!%p1400_p13), %v1749_v53 }
 0x149   : > { %1592 = vmatprep.subr.bf16.mxu1 %v700_v57  ;;  %1614 = vmatprep.subr.bf16.mxu0 (!%p1400_p13), %v1742_v50 }
 0x14a   : > { %1593 = vmatpush3.bf16.msra.mxu1 %v700_v57  ;;  %v1747_v57 = vld [vmem:[%s2077_s4 + $0x30] sm:$0xff] (!%p1400_p13)  }
 0x14b   : > { %1594 = vmatprep.subr.bf16.mxu1 %v701_v55 }
 0x14c   : > { %1615 = vmatpush3.bf16.msra.mxu0 (!%p1400_p13), %v1742_v50 }
 0x14d   : > { %1616 = vmatprep.subr.bf16.mxu0 (!%p1400_p13), %v1743_v51 }
 0x14e   : > { %1595 = vmatpush3.bf16.msra.mxu1 %v701_v55  ;;  %v1745_v55 = vld [vmem:[%s2077_s4 + $0x20] sm:$0xff] (!%p1400_p13)  }
 0x14f   : > { %1644 = vmatprep.subr.bf16.mxu1 (!%p1400_p13), %v1741_v49 }
 0x150   : > { %1617 = vmatpush3.bf16.msra.mxu0 (!%p1400_p13), %v1743_v51 }
 0x151   : > { %1597 = vmatmul.mubr.bf16.vlgmr.msra.gmra.mrb[0].mxu1 %v1734_v58  ;;  %1618 = vmatprep.subr.bf16.mxu0 (!%p1400_p13), %v1744_v52  ;;  %v1748_v58 = vld [vmem:[%s2077_s4 + $0x38] sm:$0xff] (!%p1400_p13)  }
 0x152   : > { %1600 = vmatprep.mubr.bf16.mxu1 %v1735_v59  ;;  %1652 = vmatpush3.bf16.msra.mxu1 (!%p1400_p13), %v1741_v49  ;;  %v1751_v59 = vld [vmem:[%s1940_s17 + $0x8] sm:$0xff] (!%p1400_p13)  }
 0x153   : > { %1645 = vmatprep.subr.bf16.mxu1 (!%p1400_p13), %v1742_v50 }
 0x154   : > { %1619 = vmatpush3.bf16.msra.mxu0 (!%p1400_p13), %v1744_v52 }
 0x155   : > { %1620 = vmatprep.subr.bf16.mxu0 (!%p1400_p13), %v1745_v55 }
 0x156   : > { %1653 = vmatpush3.bf16.msra.mxu1 (!%p1400_p13), %v1742_v50 }
 0x157   : > { %1646 = vmatprep.subr.bf16.mxu1 (!%p1400_p13), %v1743_v51 }
 0x158   : > { %1621 = vmatpush3.bf16.msra.mxu0 (!%p1400_p13), %v1745_v55 }
 0x159   : > { %1601 = vmatmul.mubr.bf16.gmra.mrb[4].mxu1 %v1736_v60  ;;  %1622 = vmatprep.subr.bf16.mxu0 (!%p1400_p13), %v1746_v56  ;;  %v1752_v60 = vld [vmem:[%s1940_s17 + $0x28] sm:$0xff] (!%p1400_p13)  }
 0x15a   : > { %1604 = vmatprep.mubr.bf16.mxu1 %v1737_v61  ;;  %1654 = vmatpush3.bf16.msra.mxu1 (!%p1400_p13), %v1743_v51  ;;  %v1753_v61 = vld [vmem:[%s1940_s17 + $0x10] sm:$0xff] (!%p1400_p13)  }
 0x15b   : > { %1647 = vmatprep.subr.bf16.mxu1 (!%p1400_p13), %v1744_v52 }
 0x15c   : > { %1623 = vmatpush3.bf16.msra.mxu0 (!%p1400_p13), %v1746_v56 }
 0x15d   : > { %1624 = vmatprep.subr.bf16.mxu0 (!%p1400_p13), %v1747_v57 }
 0x15e   : > { %1655 = vmatpush3.bf16.msra.mxu1 (!%p1400_p13), %v1744_v52 }
 0x15f   : > { %1648 = vmatprep.subr.bf16.mxu1 (!%p1400_p13), %v1745_v55 }
 0x160   : > { %1625 = vmatpush3.bf16.msra.mxu0 (!%p1400_p13), %v1747_v57 }
 0x161   : > { %1605 = vmatmul.mubr.bf16.gmra.mrb[8].mxu1 %v1738_v62  ;;  %1626 = vmatprep.subr.bf16.mxu0 (!%p1400_p13), %v1748_v58  ;;  %v1754_v62 = vld [vmem:[%s1940_s17 + $0x30] sm:$0xff] (!%p1400_p13)  }
 0x162   : > { %1608 = vmatprep.mubr.bf16.mxu1 %v1739_v63  ;;  %1656 = vmatpush3.bf16.msra.mxu1 (!%p1400_p13), %v1745_v55  ;;  %v1755_v63 = vld [vmem:[%s1940_s17 + $0x18] sm:$0xff] (!%p1400_p13)  }
 0x163   : > { %1649 = vmatprep.subr.bf16.mxu1 (!%p1400_p13), %v1746_v56 }
 0x164   : > { %1627 = vmatpush3.bf16.msra.mxu0 (!%p1400_p13), %v1748_v58 }
 0x166   : > { %1657 = vmatpush3.bf16.msra.mxu1 (!%p1400_p13), %v1746_v56 }
 0x167   : > { %1650 = vmatprep.subr.bf16.mxu1 (!%p1400_p13), %v1747_v57  ;;  %1629 = vmatmul.mubr.bf16.vlgmr.msra.gmra.mrb[0].mxu0 (!%p1400_p13), %v1751_v59 }
 0x168   : > { %1632 = vmatprep.mubr.bf16.mxu0 (!%p1400_p13), %v1753_v61 }
 0x169   : > { %1609 = vmatmul.mubr.bf16.gmra.mrb[12].mxu1 %v1740_v0  ;;  %v1756_v0 = vld [vmem:[%s1940_s17 + $0x38] sm:$0xff] (!%p1400_p13)  }
 0x16a   : > { %1636 = vmatprep.mubr.bf16.mxu1 (!%p1400_p13), %v1750_v54  ;;  %1658 = vmatpush3.bf16.msra.mxu1 (!%p1400_p13), %v1747_v57 }
 0x16b   : > { %1651 = vmatprep.subr.bf16.mxu1 (!%p1400_p13), %v1748_v58 }
 0x16e   : > { %1659 = vmatpush3.bf16.msra.mxu1 (!%p1400_p13), %v1748_v58 }
 0x16f   : > { %1633 = vmatmul.mubr.bf16.gmra.mrb[4].mxu0 (!%p1400_p13), %v1755_v63 }
 0x224   : > { %v1598_v3 = vpop.f32.mrb[0].mxu1 }
 0x225   : > { %v849_v5 = vadd.f32 %v1598_v3, %v664_v1  ;;  %v784_v6 = vpop.f32.mrb[1].mxu1 }
 0x226   : > { %v847_v8 = vadd.f32 %v784_v6, %v662_v2  ;;  %v1599_v9 = vpop.f32.mrb[2].mxu1  ;;  %v2026_v6 = vld [vmem:[%s2078_s5] ss:$0 sm:$0xff] (!%p1400_p13) }
 0x227   : > { %865 = vst [vmem:[#allocation2 + $0x10] sm:$0xff] %v849_v5  ;;  %v850_v10 = vadd.f32 %v1599_v9, %v665_v4  ;;  %v787_v11 = vpop.f32.mrb[3].mxu1  ;;  %1637 = vmatmul.mubr.bf16.vlgmr.msra.gmra.mrb[0].mxu1 (!%p1400_p13), %v1752_v60 }
 0x228   : > { %863 = vst [vmem:[#allocation2] sm:$0xff] %v847_v8  ;;  %v848_v12 = vadd.f32 %v787_v11, %v663_v7  ;;  %1640 = vmatprep.mubr.bf16.mxu1 (!%p1400_p13), %v1754_v62 }
 0x229   : > { %866 = vst [vmem:[#allocation2 + $0x18] sm:$0xff] %v850_v10 }
 0x22a   : > { %864 = vst [vmem:[#allocation2 + $0x8] sm:$0xff] %v848_v12 }
 0x22c   : > { %v1602_v15 = vpop.f32.mrb[4].mxu1 }
 0x22d   : > { %v853_v17 = vadd.f32 %v1602_v15, %v668_v13  ;;  %v800_v18 = vpop.f32.mrb[5].mxu1 }
 0x22e   : > { %v851_v20 = vadd.f32 %v800_v18, %v666_v14  ;;  %v1603_v21 = vpop.f32.mrb[6].mxu1  ;;  %v885_v1 = vld [vmem:[#allocation2 + $0x10] sm:$0xff] (!%p1400_p13) }
 0x22f   : > { %869 = vst [vmem:[#allocation2 + $0x30] sm:$0xff] %v853_v17  ;;  %v854_v22 = vadd.f32 %v1603_v21, %v669_v16  ;;  %v803_v23 = vpop.f32.mrb[7].mxu1  ;;  %1641 = vmatmul.mubr.bf16.gmra.mrb[4].mxu1 (!%p1400_p13), %v1756_v0  ;;  %v883_v3 = vld [vmem:[#allocation2] sm:$0xff] (!%p1400_p13) }
 0x230   : > { %867 = vst [vmem:[#allocation2 + $0x20] sm:$0xff] %v851_v20  ;;  %v852_v24 = vadd.f32 %v803_v23, %v667_v19  ;;  %v886_v8 = vld [vmem:[#allocation2 + $0x18] sm:$0xff] (!%p1400_p13) }
 0x231   : > { %870 = vst [vmem:[#allocation2 + $0x38] sm:$0xff] %v854_v22  ;;  %v884_v14 = vld [vmem:[#allocation2 + $0x8] sm:$0xff] (!%p1400_p13) }
 0x232   : > { %868 = vst [vmem:[#allocation2 + $0x28] sm:$0xff] %v852_v24 }
 0x234   : > { %v1606_v27 = vpop.f32.mrb[8].mxu1 }
 0x235   : > { %v857_v29 = vadd.f32 %v1606_v27, %v672_v25  ;;  %v816_v30 = vpop.f32.mrb[9].mxu1 }
 0x236   : > { %v855_v32 = vadd.f32 %v816_v30, %v670_v26  ;;  %v1607_v33 = vpop.f32.mrb[10].mxu1 }
 0x237   : > { %873 = vst [vmem:[#allocation2 + $0x50] sm:$0xff] %v857_v29  ;;  %v858_v34 = vadd.f32 %v1607_v33, %v673_v28  ;;  %v819_v35 = vpop.f32.mrb[11].mxu1 }
 0x238   : > { %871 = vst [vmem:[#allocation2 + $0x40] sm:$0xff] %v855_v32  ;;  %v856_v36 = vadd.f32 %v819_v35, %v671_v31  ;;  %v889_v32 = vld [vmem:[#allocation2 + $0x30] sm:$0xff] (!%p1400_p13) }
 0x239   : > { %874 = vst [vmem:[#allocation2 + $0x58] sm:$0xff] %v858_v34  ;;  %v888_v56 = vld [vmem:[#allocation2 + $0x28] sm:$0xff] (!%p1400_p13) }
 0x23a   : > { %872 = vst [vmem:[#allocation2 + $0x48] sm:$0xff] %v856_v36  ;;  %v1630_v5 = vpop.f32.mrb[0].mxu0 (!%p1400_p13)  ;;  %v887_v36 = vld [vmem:[#allocation2 + $0x20] sm:$0xff] (!%p1400_p13) }
 0x23b   : > { %v1126_v10 = vadd.f32 (!%p1400_p13), %v1630_v5, %v885_v1  ;;  %v1061_v12 = vpop.f32.mrb[1].mxu0 (!%p1400_p13) }
 0x23c   : > { %v1610_v39 = vpop.f32.mrb[12].mxu1  ;;  %882 = sbr.rel (%p1400_p13) target bundleno = 783 (0x30f), region = 93  ;;  %v1124_v16 = vadd.f32 (!%p1400_p13), %v1061_v12, %v883_v3  ;;  %v1631_v18 = vpop.f32.mrb[2].mxu0 (!%p1400_p13) }
 0x23d   : > { %v861_v41 = vadd.f32 %v1610_v39, %v676_v37  ;;  %v832_v42 = vpop.f32.mrb[13].mxu1  ;;  %v1149_v20 = vadd.f32 (!%p1400_p13), %v2026_v6, %v1126_v10  ;;  %v1127_v22 = vadd.f32 (!%p1400_p13), %v1631_v18, %v886_v8  ;;  %v1064_v24 = vpop.f32.mrb[3].mxu0 (!%p1400_p13) }
 0x23e   : > { %v859_v44 = vadd.f32 %v832_v42, %v674_v38  ;;  %v1611_v45 = vpop.f32.mrb[14].mxu1  ;;  %v893_v2 = vld [vmem:[#allocation2 + $0x50] sm:$0xff] (!%p1400_p13)  ;;  %v1147_v26 = vadd.f32 (!%p1400_p13), %v2026_v6, %v1124_v16  ;;  %v1125_v28 = vadd.f32 (!%p1400_p13), %v1064_v24, %v884_v14  ;;  %v890_v42 = vld [vmem:[#allocation2 + $0x38] sm:$0xff] (!%p1400_p13) }
 0x23f   : > { %877 = vst [vmem:[#allocation2 + $0x70] sm:$0xff] %v861_v41  ;;  %v862_v46 = vadd.f32 %v1611_v45, %v677_v40  ;;  %v835_v47 = vpop.f32.mrb[15].mxu1  ;;  %v891_v4 = vld [vmem:[#allocation2 + $0x40] sm:$0xff] (!%p1400_p13)  ;;  %v1150_v30 = vadd.f32 (!%p1400_p13), %v2026_v6, %v1127_v22  ;;  %v1165_v38 = vmax.f32 (!%p1400_p13), %v1149_v20, 0.0 }
 0x240   : > { %875 = vst [vmem:[#allocation2 + $0x60] sm:$0xff] %v859_v44  ;;  %v860_v48 = vadd.f32 %v835_v47, %v675_v43  ;;  %v894_v9 = vld [vmem:[#allocation2 + $0x58] sm:$0xff] (!%p1400_p13)  ;;  %v1148_v33 = vadd.f32 (!%p1400_p13), %v2026_v6, %v1125_v28  ;;  %v1163_v44 = vmax.f32 (!%p1400_p13), %v1147_v26, 0.0 }
 0x241   : > { %878 = vst [vmem:[#allocation2 + $0x78] sm:$0xff] %v862_v46  ;;  %v892_v15 = vld [vmem:[#allocation2 + $0x48] sm:$0xff] (!%p1400_p13)  ;;  %v1166_v40 = vmax.f32 (!%p1400_p13), %v1150_v30, 0.0 }
 0x242   : > { %876 = vst [vmem:[#allocation2 + $0x68] sm:$0xff] %v860_v48  ;;  %v1164_v46 = vmax.f32 (!%p1400_p13), %v1148_v33, 0.0  ;;  %v1634_v48 = vpop.f32.mrb[4].mxu0 (!%p1400_p13) }
 0x243   : > { %v1461_v50 = vpack.c.bf16 %v1166_v40, %v1165_v38  ;;  %v1130_v52 = vadd.f32 %v1634_v48, %v889_v32  ;;  %v1077_v54 = vpop.f32.mrb[5].mxu0 }
 0x244   : > { %v1456_v58 = vpack.c.bf16 %v1164_v46, %v1163_v44  ;;  %v1128_v60 = vadd.f32 %v1077_v54, %v887_v36  ;;  %v1635_v62 = vpop.f32.mrb[6].mxu0 }
 0x245   : > { %1493 = vst [vmem:[%s1945_s19 + $0x8] sm:$0xff] %v1461_v50   ;;  %v1153_v0 = vadd.f32 %v2026_v6, %v1130_v52 }
 0x246   : > { %v897_v35 = vld [vmem:[#allocation2 + $0x70] sm:$0xff]  ;;  %1457 = vst [vmem:[%s1945_s19] sm:$0xff] %v1456_v58  }
 0x247   : > { %v895_v37 = vld [vmem:[#allocation2 + $0x60] sm:$0xff] }
 0x248   : > { %v898_v43 = vld [vmem:[#allocation2 + $0x78] sm:$0xff] }
 0x249   : > { %v896_v57 = vld [vmem:[#allocation2 + $0x68] sm:$0xff] }
 0x2fa   : > { %v1638_v7 = vpop.f32.mrb[0].mxu1 }
 0x2fb   : > { %v1134_v11 = vadd.f32 %v1638_v7, %v893_v2  ;;  %v1093_v13 = vpop.f32.mrb[1].mxu1  ;;  %v1131_v2 = vadd.f32 %v1635_v62, %v890_v42  ;;  %v1151_v7 = vadd.f32 %v2026_v6, %v1128_v60 }
 0x2fc   : > { %v1132_v17 = vadd.f32 %v1093_v13, %v891_v4  ;;  %v1639_v19 = vpop.f32.mrb[2].mxu1  ;;  %v1080_v4 = vpop.f32.mrb[7].mxu0 }
 0x2fd   : > { %v1157_v21 = vadd.f32 %v2026_v6, %v1134_v11  ;;  %v1135_v23 = vadd.f32 %v1639_v19, %v894_v9  ;;  %v1096_v25 = vpop.f32.mrb[3].mxu1  ;;  %v1129_v9 = vadd.f32 %v1080_v4, %v888_v56  ;;  %v1154_v11 = vadd.f32 %v2026_v6, %v1131_v2 }
 0x2fe   : > { %v1155_v27 = vadd.f32 %v2026_v6, %v1132_v17  ;;  %v1133_v29 = vadd.f32 %v1096_v25, %v892_v15  ;;  %v1169_v15 = vmax.f32 %v1153_v0, 0.0  ;;  %v1167_v19 = vmax.f32 %v1151_v7, 0.0 }
 0x2ff   : > { %v1158_v31 = vadd.f32 %v2026_v6, %v1135_v23  ;;  %v1173_v39 = vmax.f32 %v1157_v21, 0.0  ;;  %v1152_v13 = vadd.f32 %v2026_v6, %v1129_v9  ;;  %v1170_v17 = vmax.f32 %v1154_v11, 0.0 }
 0x300   : > { %v1156_v34 = vadd.f32 %v2026_v6, %v1133_v29  ;;  %v1171_v45 = vmax.f32 %v1155_v27, 0.0 }
 0x301   : > { %v1174_v41 = vmax.f32 %v1158_v31, 0.0  ;;  %v1168_v21 = vmax.f32 %v1152_v13, 0.0  ;;  %v1471_v23 = vpack.c.bf16 %v1170_v17, %v1169_v15 }
 0x302   : > { %v1172_v47 = vmax.f32 %v1156_v34, 0.0  ;;  %v1642_v49 = vpop.f32.mrb[4].mxu1 }
 0x303   : > { %v1481_v51 = vpack.c.bf16 %v1174_v41, %v1173_v39  ;;  %v1138_v53 = vadd.f32 %v1642_v49, %v897_v35  ;;  %v1109_v55 = vpop.f32.mrb[5].mxu1  ;;  %v1466_v25 = vpack.c.bf16 %v1168_v21, %v1167_v19  ;;  %1495 = vst [vmem:[%s1945_s19 + $0x18] sm:$0xff] %v1471_v23  }
 0x304   : > { %v1476_v59 = vpack.c.bf16 %v1172_v47, %v1171_v45  ;;  %v1136_v61 = vadd.f32 %v1109_v55, %v895_v37  ;;  %v1643_v63 = vpop.f32.mrb[6].mxu1 }
 0x305   : > { %1497 = vst [vmem:[%s1945_s19 + $0x28] sm:$0xff] %v1481_v51   ;;  %v1161_v1 = vadd.f32 %v2026_v6, %v1138_v53  ;;  %v1139_v3 = vadd.f32 %v1643_v63, %v898_v43  ;;  %v1112_v5 = vpop.f32.mrb[7].mxu1  ;;  %1494 = vst [vmem:[%s1945_s19 + $0x10] sm:$0xff] %v1466_v25  }
 0x306   : > { %1496 = vst [vmem:[%s1945_s19 + $0x20] sm:$0xff] %v1476_v59   ;;  %v1159_v8 = vadd.f32 %v2026_v6, %v1136_v61  ;;  %v1137_v10 = vadd.f32 %v1112_v5, %v896_v57 }
 0x307   : > { %v1162_v12 = vadd.f32 %v2026_v6, %v1139_v3  ;;  %v1177_v16 = vmax.f32 %v1161_v1, 0.0 }
 0x308   : > { %v1160_v14 = vadd.f32 %v2026_v6, %v1137_v10  ;;  %v1175_v20 = vmax.f32 %v1159_v8, 0.0 }
 0x309   : > { %v1178_v18 = vmax.f32 %v1162_v12, 0.0 }
 0x30a   : > { %v1176_v22 = vmax.f32 %v1160_v14, 0.0 }
 0x30b   : > { %v1491_v24 = vpack.c.bf16 %v1178_v18, %v1177_v16 }
 0x30c   : > { %v1486_v26 = vpack.c.bf16 %v1176_v22, %v1175_v20 }
 0x30d   : > { %1499 = vst [vmem:[%s1945_s19 + $0x38] sm:$0xff] %v1491_v24  }
 0x30e   : > { %1498 = vst [vmem:[%s1945_s19 + $0x30] sm:$0xff] %v1486_v26  }
 0x30f PF: > { %s16_s27 = sadd.s32 1, %s1811_s27   ;;  %s2080_s21 = smov %s1791_s22 }
 0x310   : > { %p13_p0 = scmp.ge.s32.totalorder %s16_s27, 6   ;;  %s2081_s22 = smov %s1900_s10 }
 0x311   : > { %s2082_s23 = smov %s1803_s25  ;;  %s2083_s24 = smov %s1807_s26 }
 0x312   : > { %s2084_s25 = smov %s2087_s28  ;;  %s2085_s26 = smov %s2091_s29 }
 0x313   :  { %15 = sbr.rel (!%p13_p0) target bundleno = 4 (0x4), region = 134 }

</bundles_post_ra>
